<compile_context>
chip_gen: v5e
topology: v5e:2x2
jax: 0.10.0
libtpu: 0.0.40
codegen_flags: <defaults>
</compile_context>

<pallas_src>
import jax
import jax.numpy as jnp
from jax.experimental import pallas as pl
from jax.experimental.pallas import tpu as pltpu


def _division_space_kernel(x_ref, w_ref, b_ref, o_ref):
    # One row tile per grid step: MXU matmul, VPU bias-add + zero-fixup,
    # EUP reciprocal, VPU multiply.
    x = x_ref[...]
    feat = jnp.dot(x, w_ref[...], preferred_element_type=jnp.float32)
    feat = feat + b_ref[...]                               # (TM, N) + (1, N)
    feat = jnp.where(feat == 0.0, jnp.float32(0.0001), feat)
    inv = pl.reciprocal(feat, approx=False)                # EUP slot, exact
    o_ref[...] = (x.astype(jnp.float32) * inv).astype(o_ref.dtype)


def _round_up(x, m):
    return (x + m - 1) // m * m


def _choose_row_tile(M, K, N, itemsize, vmem_budget_bytes=24 * 1024 * 1024):
    """Pick the largest row tile that keeps VMEM usage under a conservative
    budget that fits the default scoped limit on v5e/v6e/v7x alike."""
    resident = (K * N + N) * itemsize          # weight + bias (resident, 1 copy)
    per_row = 2 * (K + N) * itemsize           # x tile + out tile, double-buffered
    avail = max(vmem_budget_bytes - resident, 1 << 20)
    tm = int(avail // per_row)
    tm = max(8, (tm // 8) * 8)                 # f32 sublane granularity
    tm = min(tm, 1024)                         # diminishing returns beyond this
    tm = min(tm, _round_up(M, 8))              # never exceed (padded) M
    return tm


def division_space(inputs, weight, bias, *, row_tile=None):
    """inputs: (M, K) f32, weight: (K, N) f32, bias: (N,) f32; returns (M, N)."""
    M, K = inputs.shape
    Kw, N = weight.shape
    assert K == Kw, "weight first dim must match inputs feature dim"
    assert K == N, "division_space requires in_units == units for the final divide"
    assert inputs.dtype == jnp.float32, "kernel tiling assumes f32 (8-row sublane)"
    # TODO(synk): for very large K=N (weight no longer VMEM-resident) add a
    # K-reduction grid axis with an f32 accumulator instead of this design.

    bias2d = bias.reshape(1, N).astype(jnp.float32)   # lane-aligned 2-D tile

    TM = row_tile if row_tile is not None else _choose_row_tile(M, K, N, 4)
    grid_m = pl.cdiv(M, TM)

    return pl.pallas_call(
        _division_space_kernel,
        out_shape=jax.ShapeDtypeStruct((M, N), inputs.dtype),
        grid=(grid_m,),
        in_specs=[
            pl.BlockSpec((TM, K), lambda i: (i, 0)),   # row tile of x (pipelined)
            pl.BlockSpec((K, N), lambda i: (0, 0)),    # weight: resident
            pl.BlockSpec((1, N), lambda i: (0, 0)),    # bias: resident
        ],
        out_specs=pl.BlockSpec((TM, N), lambda i: (i, 0)),
        compiler_params=pltpu.CompilerParams(
            # Row tiles are independent -> shard across TCs on v7x megacore.
            dimension_semantics=("parallel",),
        ),
    )(inputs, weight, bias2d)


def _reference(x, w, b):
    feat = x @ w + b
    feat = jnp.where(feat == 0.0, 0.0001, feat)
    return x / feat


if __name__ == "__main__":
    key = jax.random.PRNGKey(0)
    k_x, k_w, k_b, k_x2 = jax.random.split(key, 4)

    # Small shapes consistent with the module: batch=8, in_units=units=128.
    M, K = 8, 128
    N = K
    x = jax.random.normal(k_x, (M, K), dtype=jnp.float32)
    w = jax.random.normal(k_w, (K, N), dtype=jnp.float32)
    b = jax.random.normal(k_b, (N,), dtype=jnp.float32)

    out = jax.block_until_ready(division_space(x, w, b))
    ref = _reference(x, w, b)
    assert out.shape == (M, N)
    assert jnp.allclose(out, ref, atol=1e-5, rtol=1e-5)

    # Second check exercising the multi-step pipelined grid (4 row tiles).
    M2 = 512
    x2 = jax.random.normal(k_x2, (M2, K), dtype=jnp.float32)
    out2 = jax.block_until_ready(division_space(x2, w, b, row_tile=128))
    ref2 = _reference(x2, w, b)
    assert out2.shape == (M2, N)
    assert jnp.allclose(out2, ref2, atol=1e-5, rtol=1e-5)

    print("KERNEL_OK")
</pallas_src>

<mosaic_0001>
module attributes {stable_mosaic.version = 11 : i64} {
  func.func @_division_space_kernel(%arg0: i32, %arg1: memref<8x128xf32, #tpu.memory_space<vmem>>, %arg2: memref<128x128xf32, #tpu.memory_space<vmem>>, %arg3: memref<1x128xf32, #tpu.memory_space<vmem>>, %arg4: memref<8x128xf32, #tpu.memory_space<vmem>>) attributes {dimension_semantics = [#tpu.dimension_semantics<parallel>], iteration_bounds = array<i64: 1>, scalar_prefetch = 0 : i64, scratch_operands = 0 : i64, tpu.core_type = #tpu.core_type<tc>, window_params = [{transform_indices = @transform_0, window_bounds = array<i64: 8, 128>}, {pipeline_mode = #tpu.pipeline_mode<synchronous>, transform_indices = @transform_1, window_bounds = array<i64: 128, 128>}, {pipeline_mode = #tpu.pipeline_mode<synchronous>, transform_indices = @transform_2, window_bounds = array<i64: 1, 128>}, {transform_indices = @transform_3, window_bounds = array<i64: 8, 128>}]} {
    %c0 = arith.constant 0 : index
    %c0_0 = arith.constant 0 : index
    %0 = vector.load %arg1[%c0, %c0_0] : memref<8x128xf32, #tpu.memory_space<vmem>>, vector<8x128xf32>
    %c0_1 = arith.constant 0 : index
    %c0_2 = arith.constant 0 : index
    %1 = vector.load %arg2[%c0_1, %c0_2] : memref<128x128xf32, #tpu.memory_space<vmem>>, vector<128x128xf32>
    %cst = arith.constant dense<0.000000e+00> : vector<8x128xf32>
    %2 = tpu.matmul %0, %1, %cst {dimension_numbers = #tpu.dot_dimension_numbers<[1], [0], [0], [1], [0, 0, 1, 1], [], []>} : vector<8x128xf32>, vector<128x128xf32>, vector<8x128xf32> -> vector<8x128xf32>
    %c0_3 = arith.constant 0 : index
    %c0_4 = arith.constant 0 : index
    %3 = vector.load %arg3[%c0_3, %c0_4] : memref<1x128xf32, #tpu.memory_space<vmem>>, vector<1x128xf32>
    %4 = vector.broadcast %3 : vector<1x128xf32> to vector<8x128xf32>
    %5 = arith.addf %2, %4 : vector<8x128xf32>
    %cst_5 = arith.constant 0.000000e+00 : f32
    %6 = vector.broadcast %cst_5 : f32 to vector<8x128xf32>
    %7 = arith.cmpf oeq, %5, %6 : vector<8x128xf32>
    %cst_6 = arith.constant 9.99999974E-5 : f32
    %8 = vector.broadcast %cst_6 : f32 to vector<8x128xf32>
    %9 = arith.select %7, %8, %5 : vector<8x128xi1>, vector<8x128xf32>
    %10 = tpu.reciprocal %9 : vector<8x128xf32> -> vector<8x128xf32>
    %11 = arith.mulf %0, %10 : vector<8x128xf32>
    %c0_7 = arith.constant 0 : index
    %c0_8 = arith.constant 0 : index
    %12 = vector.load %arg4[%c0_7, %c0_8] : memref<8x128xf32, #tpu.memory_space<vmem>>, vector<8x128xf32>
    tpu.vector_store %arg4[%c0_7, %c0_8], %11 {strides = array<i32>} : memref<8x128xf32, #tpu.memory_space<vmem>>, vector<8x128xf32>,
    return
  }
  func.func @transform_0(%arg0: i32) -> (i32, i32) {
    %c0_i32 = arith.constant 0 : i32
    %c0_i32_0 = arith.constant 0 : i32
    return %arg0, %c0_i32 : i32, i32
  }
  func.func @transform_1(%arg0: i32) -> (i32, i32) {
    %c0_i32 = arith.constant 0 : i32
    %c0_i32_0 = arith.constant 0 : i32
    %c0_i32_1 = arith.constant 0 : i32
    return %c0_i32, %c0_i32_0 : i32, i32
  }
  func.func @transform_2(%arg0: i32) -> (i32, i32) {
    %c0_i32 = arith.constant 0 : i32
    %c0_i32_0 = arith.constant 0 : i32
    %c0_i32_1 = arith.constant 0 : i32
    return %c0_i32, %c0_i32_0 : i32, i32
  }
  func.func @transform_3(%arg0: i32) -> (i32, i32) {
    %c0_i32 = arith.constant 0 : i32
    %c0_i32_0 = arith.constant 0 : i32
    return %arg0, %c0_i32 : i32, i32
  }
}

</mosaic_0001>

<bundles_post_ra>
// kernel: tpu_custom_call.1
= control target key start
LH: loop header
LB: loop body
LE: loop exit
PB: predicated region body
PF: predicated region fallthrough
CT: control target
= control target key end

     0   :  { %8 = vsyncpa [#allocation3], 0  ;;  %s245_s0 = inlined_call_operand.hbm [shape: f32[8,128], index: 0, kind: input, shape index: {}]   ;;  %s246_s1 = inlined_call_operand.hbm [shape: f32[128,128], index: 1, kind: input, shape index: {}]   ;;  %s247_s2 = inlined_call_operand.vmem [shape: f32[1,128], index: 2, kind: input, shape index: {}]   ;;  %s248_s3 = inlined_call_operand.hbm [shape: f32[8,128], index: 3, kind: output, shape index: {}]  }
   0x1   :  { %9 = vsyncpa [#allocation6], 0 }
   0x2   :  { %10 = vsyncpa [#allocation4], 0  ;;  %s16_s14 = sshll.u32 %s245_s0, 4  ;;  %s208_s15 = smov [#allocation2]   ;;  %s17_s14 = int_to_ptr.hbm [resolvable:$true] %s16_s14 }
   0x3   :  { %s18_s16 = sshll.u32 %s208_s15, 4  ;;  %s26_s19 = sshll.u32 %s246_s1, 4  ;;  %s19_s16 = int_to_ptr.vmem [resolvable:$true] %s18_s16  ;;  %s27_s19 = int_to_ptr.hbm [resolvable:$true] %s26_s19 }
   0x4   :  { %21 = dma.hbm_to_vmem [thread:$0]  %s17_s14, 128, %s19_s16, [#allocation3]  }
   0x5   :  { %s209_s20 = smov [#allocation5]   ;;  %s210_s22 = smov 128  }
   0x6   :  { %s28_s21 = sshll.u32 %s209_s20, 4  ;;  %s211_s23 = smov 8   ;;  %s29_s21 = int_to_ptr.vmem [resolvable:$true] %s28_s21 }
   0x7   :  { %34 = dma.hbm_to_vmem [thread:$0]  %s27_s19, 2048, %s29_s21, [#allocation6], %s210_s22, %s210_s22, %s211_s23  }
   0x8   :  { %202 = dma.done.wait [#allocation3], 128  }
   0x9   :  { %203 = vsyncadd [#allocation3], 4294967168 }
   0xa   :  { %204 = dma.done.wait [#allocation6], 2048  }
   0xb   :  { %205 = vsyncadd [#allocation6], 4294965248  ;;  %v61_v0 = vld [vmem:[#allocation5 + $0x78] sm:$0xff]  ;;  %v60_v1 = vld [vmem:[#allocation5 + $0x70] sm:$0xff]  ;;  %s212_s24 = smov [#allocation7]   ;;  %s111_s27 = sshll.u32 %s248_s3, 4  ;;  %s112_s27 = int_to_ptr.hbm [resolvable:$true] %s111_s27 }
   0xc   :  { %66 = vmatpush.msra.mxu0 %v61_v0  ;;  %v59_v2 = vld [vmem:[#allocation5 + $0x68] sm:$0xff]  ;;  %v58_v3 = vld [vmem:[#allocation5 + $0x60] sm:$0xff]  ;;  %v57_v4 = vld [vmem:[#allocation5 + $0x58] sm:$0xff]  ;;  %s109_s25 = sshll.u32 %s212_s24, 4  ;;  %s110_s25 = int_to_ptr.vmem [resolvable:$true] %s109_s25 }
   0xd   :  { %v56_v5 = vld [vmem:[#allocation5 + $0x50] sm:$0xff]  ;;  %v55_v6 = vld [vmem:[#allocation5 + $0x48] sm:$0xff]  ;;  %v54_v7 = vld [vmem:[#allocation5 + $0x40] sm:$0xff] }
   0xe   :  { %67 = vmatpush.msra.mxu0 %v60_v1  ;;  %v53_v8 = vld [vmem:[#allocation5 + $0x38] sm:$0xff]  ;;  %v52_v9 = vld [vmem:[#allocation5 + $0x30] sm:$0xff]  ;;  %v51_v10 = vld [vmem:[#allocation5 + $0x28] sm:$0xff] }
   0xf   :  { %v50_v11 = vld [vmem:[#allocation5 + $0x20] sm:$0xff]  ;;  %v49_v12 = vld [vmem:[#allocation5 + $0x18] sm:$0xff]  ;;  %v48_v13 = vld [vmem:[#allocation5 + $0x10] sm:$0xff] }
  0x10   :  { %68 = vmatpush.msra.mxu0 %v59_v2  ;;  %v47_v14 = vld [vmem:[#allocation5 + $0x8] sm:$0xff]  ;;  %v46_v15 = vld [vmem:[#allocation5] sm:$0xff]  ;;  %v45_v16 = vld [vmem:[#allocation2] sm:$0xff] }
  0x11   :  { %v127_v17 = vld [vmem:[%s247_s2] ss:$0 sm:$0xff] }
  0x12   :  { %69 = vmatpush.msra.mxu0 %v58_v3 }
  0x14   :  { %70 = vmatpush.msra.mxu0 %v57_v4 }
  0x16   :  { %71 = vmatpush.msra.mxu0 %v56_v5 }
  0x18   :  { %72 = vmatpush.msra.mxu0 %v55_v6 }
  0x1a   :  { %73 = vmatpush.msra.mxu0 %v54_v7 }
  0x1c   :  { %74 = vmatpush.msra.mxu0 %v53_v8 }
  0x1e   :  { %75 = vmatpush.msra.mxu0 %v52_v9 }
  0x20   :  { %76 = vmatpush.msra.mxu0 %v51_v10 }
  0x22   :  { %77 = vmatpush.msra.mxu0 %v50_v11 }
  0x24   :  { %78 = vmatpush.msra.mxu0 %v49_v12 }
  0x26   :  { %79 = vmatpush.msra.mxu0 %v48_v13 }
  0x28   :  { %80 = vmatpush.msra.mxu0 %v47_v14 }
  0x2a   :  { %81 = vmatpush.msra.mxu0 %v46_v15 }
  0x2b   :  { %82 = vmatmul.f32.vlgmr.msra.gmra.mxu0 %v45_v16 }
  0xa8   :  { %v83_v18 = vpop.f32.mrf.mxu0 }
  0xa9   :  { %v84_v19 = vadd.f32 %v127_v17, %v83_v18 }
  0xab   :  { %vm86_vm0 = vcmp.eq.f32.partialorder %v84_v19, 0.0 }
  0xac   :  { %v87_v20 = vsel %vm86_vm0, 0.0001, %v84_v19 }
  0xad   :  { %128 = vrcp.f32 %v87_v20  ;;  %v99_v24 = vand.u32 2147483648, %v87_v20  ;;  %v97_v26 = vand.u32 2147483647, %v87_v20  ;;  %vm93_vm2 = vweird.f32 %v87_v20 }
  0xaf   :  { %v100_v28 = vor.u32 1.1754944e-38, %v99_v24  ;;  %vm98_vm4 = vcmp.eq.f32.partialorder %v97_v26, 8.507059e+37 }
  0xb3   :  { %v129_v21 = vpop.eup %128 }
  0xb4   :  { %v89_v22 = vmul.f32 %v129_v21, %v87_v20  ;;  %vm94_vm1 = vweird.f32 %v129_v21 }
  0xb5   :  { %vm95_vm3 = vmor %vm93_vm2, %vm94_vm1 }
  0xb6   :  { %v90_v23 = vsub.f32 1.0, %v89_v22 }
  0xb8   :  { %v91_v25 = vmul.f32 %v129_v21, %v90_v23 }
  0xba   :  { %v92_v27 = vadd.f32 %v129_v21, %v91_v25 }
  0xbc   :  { %v96_v29 = vsel %vm95_vm3, %v129_v21, %v92_v27 }
  0xbd   :  { %v101_v30 = vsel %vm98_vm4, %v100_v28, %v96_v29 }
  0xbe   :  { %v102_v31 = vmul.f32 %v101_v30, %v45_v16 }
  0xc0   :  { %103 = vst [vmem:[#allocation7] sm:$0xff] %v102_v31 }
  0xc1   :  { %114 = dma.vmem_to_hbm [thread:$0]  %s110_s25, 128, %s112_s27, [#allocation4]  }
  0xc2   :  { %206 = dma.done.wait [#allocation4], 128  }
  0xc3   :  { %207 = vsyncadd [#allocation4], 4294967168 }
  0xc4   :  { %119 = vsyncpa [#allocation3], 1 }
  0xc5   :  { %120 = vsyncpa [#allocation6], 1 }
  0xc6   :  { %121 = vsyncpa [#allocation4], 1 }

</bundles_post_ra>
